<compile_context>
chip_gen: v7x
topology: tpu7x:2x2x1
jax: 0.10.0
libtpu: 0.0.40
codegen_flags: <defaults>
</compile_context>

<pallas_src>
import functools

import jax
import jax.numpy as jnp
from jax.experimental import pallas as pl
from jax.experimental.pallas import tpu as pltpu

EPS = 1e-6
GEO_CH = 8
LANE = 128


def _round_up(x, m):
    return (x + m - 1) // m * m


def _vmem_budgets():
    """Per-generation (input-block byte budget per step, scoped VMEM limit)."""
    try:
        cap = getattr(pltpu.get_tpu_info(), "vmem_capacity_bytes",
                      64 * 1024 * 1024)
    except Exception:  # conservative fallback if the query is unavailable
        cap = 64 * 1024 * 1024
    if cap >= 100 * 1024 * 1024:            # v5e / v6e: 128 MiB physical VMEM
        return 16 * 1024 * 1024, 64 * 1024 * 1024
    # v7x: 64 MiB per TensorCore -> keep 2x double-buffered inputs well inside.
    return 12 * 1024 * 1024, 48 * 1024 * 1024


def _choose_tiling(rows, r_target):
    """Pick (num_splits, steps, R) with num_splits * steps * R == rows exactly.

    Prefers a leading split of 2 (maps to the two TensorCores on v7x via the
    'parallel' grid axis; harmless on 1-TC chips).  R is either a multiple of
    8 (tiled case) or the full row extent (single-block case).  Returns None
    if no clean factorisation exists (rare; caller falls back to padding).
    """
    r_target = max(8, r_target)
    for num_splits in (2, 1):
        if rows % num_splits:
            continue
        per = rows // num_splits
        if num_splits == 1 and per <= r_target:
            return 1, 1, per                 # single full-extent block
        best = 0
        for cand in range(8, min(per, r_target) + 1, 8):
            if per % cand == 0:
                best = cand                  # largest multiple-of-8 divisor
        if best:
            return num_splits, per // best, best
    return None


def _east_loss_kernel(sp_ref, sg_ref, gp_ref, gg_ref, out_ref, acc,
                      *, foldable):
    t = pl.program_id(1)

    @pl.when(t == 0)
    def _():
        acc[...] = jnp.zeros_like(acc)

    def fold(x):
        # (N, R, 128) -> (8, 128): the reshape only regroups whole (8, 128)
        # sublane tiles (layout-preserving, no data movement); the sum over
        # the leading axis is a pure elementwise VPU add chain (no XLU).
        if not foldable:
            return x
        return jnp.sum(x.reshape(-1, 8, LANE), axis=0)

    sg = sg_ref[...].astype(jnp.float32)          # (N, R, 128)
    sp = sp_ref[...].astype(jnp.float32)

    # ---- dice-loss partial sums ----
    p = 1.0 / (1.0 + jnp.exp(-sp))                # sigmoid (EUP exp + divide)
    acc[0] += fold(p * sg)
    acc[1] += fold(sg)

    # ---- smooth-L1 over the 8 geo channels, unrolled per channel so only a
    #      few block-sized f32 temporaries are live at once (no (N,8,R,128)
    #      materialization).  Branch-free form: d<1 -> d^2/2, else d-1/2.
    sl = jnp.zeros_like(sg)
    for c in range(GEO_CH):
        d = jnp.abs(gg_ref[:, c, :, :].astype(jnp.float32)
                    - gp_ref[:, c, :, :].astype(jnp.float32))
        dm = jnp.minimum(d, 1.0)
        sl = sl + dm * (d - 0.5 * dm)
    acc[2] += fold(sl * sg)

    @pl.when(t == pl.num_programs(1) - 1)
    def _():
        out_ref[0] = acc[...]


def east_loss(score_map_pred, score_map_gt, geo_pred, geo_gt):
    N, H, W = score_map_pred.shape
    C_geo = geo_pred.shape[1]
    assert C_geo >= GEO_CH and geo_gt.shape[1] >= GEO_CH
    HW = H * W

    block_budget, vmem_limit = _vmem_budgets()

    # ---- flatten spatial dims (contiguous reshapes, no HBM copies; geo stays
    #      in native (N, C, HW) order — the first-8-channel split is done
    #      purely via the BlockSpec block index, no transpose/slice pass) ----
    sp = score_map_pred.reshape(N, HW)
    sg = score_map_gt.reshape(N, HW)
    gp = geo_pred.reshape(N, C_geo, HW)
    gg = geo_gt.reshape(N, C_geo, HW)

    rows = _round_up(HW, LANE) // LANE

    bytes_per_row = N * LANE * (
        sp.dtype.itemsize + sg.dtype.itemsize
        + GEO_CH * (gp.dtype.itemsize + gg.dtype.itemsize))
    r_target = max(8, block_budget // bytes_per_row)

    tiling = _choose_tiling(rows, r_target)
    if tiling is not None:
        num_splits, steps, R = tiling
        rows_pad = rows
    else:
        # Rare fallback: no clean factorisation of `rows`; pad the row axis.
        # Zero padding is exact: every accumulated term either is score_gt or
        # carries a score_gt factor, which is zero in the pad region.
        num_splits = 1
        R = max(8, (min(r_target, rows) // 8) * 8)
        rows_pad = _round_up(rows, R)
        steps = rows_pad // R

    HW_pad = rows_pad * LANE
    if HW_pad != HW:
        pad = HW_pad - HW
        sp = jnp.pad(sp, ((0, 0), (0, pad)))
        sg = jnp.pad(sg, ((0, 0), (0, pad)))
        gp = jnp.pad(gp, ((0, 0), (0, 0), (0, pad)))
        gg = jnp.pad(gg, ((0, 0), (0, 0), (0, pad)))

    sp = sp.reshape(N, rows_pad, LANE)
    sg = sg.reshape(N, rows_pad, LANE)
    gp = gp.reshape(N, C_geo, rows_pad, LANE)
    gg = gg.reshape(N, C_geo, rows_pad, LANE)

    # Accumulator layout: fold to an (8, 128) slab when the block's row count
    # is a multiple of 8; otherwise (tiny single-block inputs) keep the block
    # shape to avoid any sublane relayout.
    foldable = (N * R) % 8 == 0
    acc_shape = (8, LANE) if foldable else (N, R, LANE)
    out_block = (1, 3) + acc_shape
    zeros_tail = (0,) * (1 + len(acc_shape))

    kernel = functools.partial(_east_loss_kernel, foldable=foldable)

    out = pl.pallas_call(
        kernel,
        out_shape=jax.ShapeDtypeStruct((num_splits, 3) + acc_shape,
                                       jnp.float32),
        grid_spec=pltpu.PrefetchScalarGridSpec(
            num_scalar_prefetch=0,
            grid=(num_splits, steps),
            in_specs=[
                pl.BlockSpec((N, R, LANE),
                             lambda c, t: (0, c * steps + t, 0)),
                pl.BlockSpec((N, R, LANE),
                             lambda c, t: (0, c * steps + t, 0)),
                # Block index 0 on the channel axis selects channels 0..7
                # (== torch.split(geo, 8, dim=1)[0]) without any HBM copy.
                pl.BlockSpec((N, GEO_CH, R, LANE),
                             lambda c, t: (0, 0, c * steps + t, 0)),
                pl.BlockSpec((N, GEO_CH, R, LANE),
                             lambda c, t: (0, 0, c * steps + t, 0)),
            ],
            out_specs=pl.BlockSpec(out_block,
                                   lambda c, t: (c,) + zeros_tail),
            scratch_shapes=[
                pltpu.VMEM((3,) + acc_shape, jnp.float32),
            ],
        ),
        compiler_params=pltpu.CompilerParams(
            dimension_semantics=("parallel", "arbitrary"),
            vmem_limit_bytes=vmem_limit,
        ),
    )(sp, sg, gp, gg)

    # ---- tiny wrapper-side finalize (combines per-core partial sums) ----
    parts = jnp.sum(out.reshape(num_splits, 3, -1), axis=(0, 2))
    inter = parts[0]
    union = inter + parts[1] + EPS          # matches DiceLoss: inter+sum(gt)+eps
    dice = 1.0 - 2.0 * inter / union
    sml = parts[2] / jnp.float32(GEO_CH * N * HW)
    return 0.01 * dice + sml


def east_loss_ref(score_map_pred, score_map_gt, geo_pred, geo_gt):
    """Pure-JAX reference matching the PyTorch EASTLoss module."""
    p = jax.nn.sigmoid(score_map_pred.astype(jnp.float32))
    gt = score_map_gt.astype(jnp.float32)
    inter = jnp.sum(p * gt)
    union = inter + jnp.sum(gt) + EPS
    dice = 1.0 - 2.0 * inter / union

    gp = geo_pred[:, :GEO_CH].astype(jnp.float32)
    gg = geo_gt[:, :GEO_CH].astype(jnp.float32)
    d = jnp.abs(gg - gp)
    pair = jnp.where(d < 1.0, 0.5 * d * d, d - 0.5) / GEO_CH
    sl = jnp.sum(pair, axis=1)              # (N, H, W)
    sml = jnp.mean(sl * gt)
    return 0.01 * dice + sml


if __name__ == "__main__":
    key = jax.random.PRNGKey(0)
    k1, k2, k3, k4 = jax.random.split(key, 4)

    N, H, W = 2, 16, 16
    score_pred = jax.random.normal(k1, (N, H, W), dtype=jnp.float32)
    score_gt = jax.random.bernoulli(k2, 0.3, (N, H, W)).astype(jnp.float32)
    geo_pred = jax.random.normal(k3, (N, GEO_CH, H, W), dtype=jnp.float32) * 2.0
    geo_gt = jax.random.normal(k4, (N, GEO_CH, H, W), dtype=jnp.float32) * 2.0

    out = east_loss(score_pred, score_gt, geo_pred, geo_gt)
    out = jax.block_until_ready(out)

    ref = east_loss_ref(score_pred, score_gt, geo_pred, geo_gt)
    assert jnp.allclose(out, ref, rtol=1e-5, atol=1e-5), (out, ref)

    print("KERNEL_OK")
</pallas_src>

<mosaic_0001>
module attributes {stable_mosaic.version = 11 : i64} {
  func.func @_east_loss_kernel(%arg0: i32, %arg1: i32, %arg2: memref<2x2x128xf32, #tpu.memory_space<vmem>>, %arg3: memref<2x2x128xf32, #tpu.memory_space<vmem>>, %arg4: memref<2x8x2x128xf32, #tpu.memory_space<vmem>>, %arg5: memref<2x8x2x128xf32, #tpu.memory_space<vmem>>, %arg6: memref<1x3x2x2x128xf32, #tpu.memory_space<vmem>>, %arg7: memref<3x2x2x128xf32, #tpu.memory_space<vmem>>) attributes {dimension_semantics = [#tpu.dimension_semantics<parallel>, #tpu.dimension_semantics<arbitrary>], iteration_bounds = array<i64: 1, 1>, scalar_prefetch = 0 : i64, scratch_operands = 1 : i64, tpu.core_type = #tpu.core_type<tc>, window_params = [{transform_indices = @transform_0, window_bounds = array<i64: 2, 2, 128>}, {transform_indices = @transform_1, window_bounds = array<i64: 2, 2, 128>}, {transform_indices = @transform_2, window_bounds = array<i64: 2, 8, 2, 128>}, {transform_indices = @transform_3, window_bounds = array<i64: 2, 8, 2, 128>}, {transform_indices = @transform_4, window_bounds = array<i64: 1, 3, 2, 2, 128>}]} {
    %c0_i32 = arith.constant 0 : i32
    %0 = arith.cmpi eq, %arg1, %c0_i32 : i32
    %1 = arith.extui %0 : i1 to i32
    %c0_i32_0 = arith.constant 0 : i32
    %2 = arith.cmpi ne, %1, %c0_i32_0 : i32
    scf.if %2 {
      %cst_108 = arith.constant 0.000000e+00 : f32
      %140 = vector.broadcast %cst_108 : f32 to vector<3x2x2x128xf32>
      %c0_109 = arith.constant 0 : index
      %c0_110 = arith.constant 0 : index
      %c0_111 = arith.constant 0 : index
      %c0_112 = arith.constant 0 : index
      %141 = vector.load %arg7[%c0_109, %c0_110, %c0_111, %c0_112] : memref<3x2x2x128xf32, #tpu.memory_space<vmem>>, vector<3x2x2x128xf32>
      tpu.vector_store %arg7[%c0_109, %c0_110, %c0_111, %c0_112], %140 {strides = array<i32>} : memref<3x2x2x128xf32, #tpu.memory_space<vmem>>, vector<3x2x2x128xf32>,
    } else {
    }
    %c0 = arith.constant 0 : index
    %c0_1 = arith.constant 0 : index
    %c0_2 = arith.constant 0 : index
    %3 = vector.load %arg3[%c0, %c0_1, %c0_2] : memref<2x2x128xf32, #tpu.memory_space<vmem>>, vector<2x2x128xf32>
    %c0_3 = arith.constant 0 : index
    %c0_4 = arith.constant 0 : index
    %c0_5 = arith.constant 0 : index
    %4 = vector.load %arg2[%c0_3, %c0_4, %c0_5] : memref<2x2x128xf32, #tpu.memory_space<vmem>>, vector<2x2x128xf32>
    %cst = arith.constant 0.000000e+00 : f32
    %5 = vector.broadcast %cst : f32 to vector<2x2x128xf32>
    %6 = arith.subf %5, %4 : vector<2x2x128xf32>
    %7 = math.exp %6 : vector<2x2x128xf32>
    %cst_6 = arith.constant 1.000000e+00 : f32
    %8 = vector.broadcast %cst_6 : f32 to vector<2x2x128xf32>
    %9 = arith.addf %8, %7 : vector<2x2x128xf32>
    %cst_7 = arith.constant 1.000000e+00 : f32
    %10 = vector.broadcast %cst_7 : f32 to vector<2x2x128xf32>
    %11 = arith.divf %10, %9 : vector<2x2x128xf32>
    %c0_8 = arith.constant 0 : index
    %c0_9 = arith.constant 0 : index
    %c0_10 = arith.constant 0 : index
    %c0_11 = arith.constant 0 : index
    %12 = vector.load %arg7[%c0_8, %c0_9, %c0_10, %c0_11] : memref<3x2x2x128xf32, #tpu.memory_space<vmem>>, vector<1x2x2x128xf32>
    %13 = vector.shape_cast %12 : vector<1x2x2x128xf32> to vector<2x2x128xf32>
    %14 = arith.mulf %11, %3 : vector<2x2x128xf32>
    %15 = arith.addf %13, %14 : vector<2x2x128xf32>
    %c0_12 = arith.constant 0 : index
    %c0_13 = arith.constant 0 : index
    %c0_14 = arith.constant 0 : index
    %c0_15 = arith.constant 0 : index
    %16 = vector.load %arg7[%c0_12, %c0_13, %c0_14, %c0_15] : memref<3x2x2x128xf32, #tpu.memory_space<vmem>>, vector<1x2x2x128xf32>
    %17 = vector.shape_cast %16 : vector<1x2x2x128xf32> to vector<2x2x128xf32>
    %18 = vector.shape_cast %15 : vector<2x2x128xf32> to vector<1x2x2x128xf32>
    tpu.vector_store %arg7[%c0_12, %c0_13, %c0_14, %c0_15], %18 {strides = array<i32>} : memref<3x2x2x128xf32, #tpu.memory_space<vmem>>, vector<1x2x2x128xf32>,
    %c1 = arith.constant 1 : index
    %c0_16 = arith.constant 0 : index
    %c0_17 = arith.constant 0 : index
    %c0_18 = arith.constant 0 : index
    %19 = vector.load %arg7[%c1, %c0_16, %c0_17, %c0_18] : memref<3x2x2x128xf32, #tpu.memory_space<vmem>>, vector<1x2x2x128xf32>
    %20 = vector.shape_cast %19 : vector<1x2x2x128xf32> to vector<2x2x128xf32>
    %21 = arith.addf %20, %3 : vector<2x2x128xf32>
    %c1_19 = arith.constant 1 : index
    %c0_20 = arith.constant 0 : index
    %c0_21 = arith.constant 0 : index
    %c0_22 = arith.constant 0 : index
    %22 = vector.load %arg7[%c1_19, %c0_20, %c0_21, %c0_22] : memref<3x2x2x128xf32, #tpu.memory_space<vmem>>, vector<1x2x2x128xf32>
    %23 = vector.shape_cast %22 : vector<1x2x2x128xf32> to vector<2x2x128xf32>
    %24 = vector.shape_cast %21 : vector<2x2x128xf32> to vector<1x2x2x128xf32>
    tpu.vector_store %arg7[%c1_19, %c0_20, %c0_21, %c0_22], %24 {strides = array<i32>} : memref<3x2x2x128xf32, #tpu.memory_space<vmem>>, vector<1x2x2x128xf32>,
    %cst_23 = arith.constant 0.000000e+00 : f32
    %25 = vector.broadcast %cst_23 : f32 to vector<2x2x128xf32>
    %c0_24 = arith.constant 0 : index
    %c0_25 = arith.constant 0 : index
    %c0_26 = arith.constant 0 : index
    %c0_27 = arith.constant 0 : index
    %26 = vector.load %arg5[%c0_24, %c0_25, %c0_26, %c0_27] : memref<2x8x2x128xf32, #tpu.memory_space<vmem>>, vector<2x1x2x128xf32>
    %27 = vector.shape_cast %26 : vector<2x1x2x128xf32> to vector<2x2x128xf32>
    %c0_28 = arith.constant 0 : index
    %c0_29 = arith.constant 0 : index
    %c0_30 = arith.constant 0 : index
    %c0_31 = arith.constant 0 : index
    %28 = vector.load %arg4[%c0_28, %c0_29, %c0_30, %c0_31] : memref<2x8x2x128xf32, #tpu.memory_space<vmem>>, vector<2x1x2x128xf32>
    %29 = vector.shape_cast %28 : vector<2x1x2x128xf32> to vector<2x2x128xf32>
    %30 = arith.subf %27, %29 : vector<2x2x128xf32>
    %31 = math.absf %30 : vector<2x2x128xf32>
    %cst_32 = arith.constant 1.000000e+00 : f32
    %32 = vector.broadcast %cst_32 : f32 to vector<2x2x128xf32>
    %33 = arith.minimumf %31, %32 : vector<2x2x128xf32>
    %cst_33 = arith.constant 5.000000e-01 : f32
    %34 = vector.broadcast %cst_33 : f32 to vector<2x2x128xf32>
    %35 = arith.mulf %34, %33 : vector<2x2x128xf32>
    %36 = arith.subf %31, %35 : vector<2x2x128xf32>
    %37 = arith.mulf %33, %36 : vector<2x2x128xf32>
    %38 = arith.addf %25, %37 : vector<2x2x128xf32>
    %c0_34 = arith.constant 0 : index
    %c1_35 = arith.constant 1 : index
    %c0_36 = arith.constant 0 : index
    %c0_37 = arith.constant 0 : index
    %39 = vector.load %arg5[%c0_34, %c1_35, %c0_36, %c0_37] : memref<2x8x2x128xf32, #tpu.memory_space<vmem>>, vector<2x1x2x128xf32>
    %40 = vector.shape_cast %39 : vector<2x1x2x128xf32> to vector<2x2x128xf32>
    %c0_38 = arith.constant 0 : index
    %c1_39 = arith.constant 1 : index
    %c0_40 = arith.constant 0 : index
    %c0_41 = arith.constant 0 : index
    %41 = vector.load %arg4[%c0_38, %c1_39, %c0_40, %c0_41] : memref<2x8x2x128xf32, #tpu.memory_space<vmem>>, vector<2x1x2x128xf32>
    %42 = vector.shape_cast %41 : vector<2x1x2x128xf32> to vector<2x2x128xf32>
    %43 = arith.subf %40, %42 : vector<2x2x128xf32>
    %44 = math.absf %43 : vector<2x2x128xf32>
    %cst_42 = arith.constant 1.000000e+00 : f32
    %45 = vector.broadcast %cst_42 : f32 to vector<2x2x128xf32>
    %46 = arith.minimumf %44, %45 : vector<2x2x128xf32>
    %cst_43 = arith.constant 5.000000e-01 : f32
    %47 = vector.broadcast %cst_43 : f32 to vector<2x2x128xf32>
    %48 = arith.mulf %47, %46 : vector<2x2x128xf32>
    %49 = arith.subf %44, %48 : vector<2x2x128xf32>
    %50 = arith.mulf %46, %49 : vector<2x2x128xf32>
    %51 = arith.addf %38, %50 : vector<2x2x128xf32>
    %c0_44 = arith.constant 0 : index
    %c2 = arith.constant 2 : index
    %c0_45 = arith.constant 0 : index
    %c0_46 = arith.constant 0 : index
    %52 = vector.load %arg5[%c0_44, %c2, %c0_45, %c0_46] : memref<2x8x2x128xf32, #tpu.memory_space<vmem>>, vector<2x1x2x128xf32>
    %53 = vector.shape_cast %52 : vector<2x1x2x128xf32> to vector<2x2x128xf32>
    %c0_47 = arith.constant 0 : index
    %c2_48 = arith.constant 2 : index
    %c0_49 = arith.constant 0 : index
    %c0_50 = arith.constant 0 : index
    %54 = vector.load %arg4[%c0_47, %c2_48, %c0_49, %c0_50] : memref<2x8x2x128xf32, #tpu.memory_space<vmem>>, vector<2x1x2x128xf32>
    %55 = vector.shape_cast %54 : vector<2x1x2x128xf32> to vector<2x2x128xf32>
    %56 = arith.subf %53, %55 : vector<2x2x128xf32>
    %57 = math.absf %56 : vector<2x2x128xf32>
    %cst_51 = arith.constant 1.000000e+00 : f32
    %58 = vector.broadcast %cst_51 : f32 to vector<2x2x128xf32>
    %59 = arith.minimumf %57, %58 : vector<2x2x128xf32>
    %cst_52 = arith.constant 5.000000e-01 : f32
    %60 = vector.broadcast %cst_52 : f32 to vector<2x2x128xf32>
    %61 = arith.mulf %60, %59 : vector<2x2x128xf32>
    %62 = arith.subf %57, %61 : vector<2x2x128xf32>
    %63 = arith.mulf %59, %62 : vector<2x2x128xf32>
    %64 = arith.addf %51, %63 : vector<2x2x128xf32>
    %c0_53 = arith.constant 0 : index
    %c3 = arith.constant 3 : index
    %c0_54 = arith.constant 0 : index
    %c0_55 = arith.constant 0 : index
    %65 = vector.load %arg5[%c0_53, %c3, %c0_54, %c0_55] : memref<2x8x2x128xf32, #tpu.memory_space<vmem>>, vector<2x1x2x128xf32>
    %66 = vector.shape_cast %65 : vector<2x1x2x128xf32> to vector<2x2x128xf32>
    %c0_56 = arith.constant 0 : index
    %c3_57 = arith.constant 3 : index
    %c0_58 = arith.constant 0 : index
    %c0_59 = arith.constant 0 : index
    %67 = vector.load %arg4[%c0_56, %c3_57, %c0_58, %c0_59] : memref<2x8x2x128xf32, #tpu.memory_space<vmem>>, vector<2x1x2x128xf32>
    %68 = vector.shape_cast %67 : vector<2x1x2x128xf32> to vector<2x2x128xf32>
    %69 = arith.subf %66, %68 : vector<2x2x128xf32>
    %70 = math.absf %69 : vector<2x2x128xf32>
    %cst_60 = arith.constant 1.000000e+00 : f32
    %71 = vector.broadcast %cst_60 : f32 to vector<2x2x128xf32>
    %72 = arith.minimumf %70, %71 : vector<2x2x128xf32>
    %cst_61 = arith.constant 5.000000e-01 : f32
    %73 = vector.broadcast %cst_61 : f32 to vector<2x2x128xf32>
    %74 = arith.mulf %73, %72 : vector<2x2x128xf32>
    %75 = arith.subf %70, %74 : vector<2x2x128xf32>
    %76 = arith.mulf %72, %75 : vector<2x2x128xf32>
    %77 = arith.addf %64, %76 : vector<2x2x128xf32>
    %c0_62 = arith.constant 0 : index
    %c4 = arith.constant 4 : index
    %c0_63 = arith.constant 0 : index
    %c0_64 = arith.constant 0 : index
    %78 = vector.load %arg5[%c0_62, %c4, %c0_63, %c0_64] : memref<2x8x2x128xf32, #tpu.memory_space<vmem>>, vector<2x1x2x128xf32>
    %79 = vector.shape_cast %78 : vector<2x1x2x128xf32> to vector<2x2x128xf32>
    %c0_65 = arith.constant 0 : index
    %c4_66 = arith.constant 4 : index
    %c0_67 = arith.constant 0 : index
    %c0_68 = arith.constant 0 : index
    %80 = vector.load %arg4[%c0_65, %c4_66, %c0_67, %c0_68] : memref<2x8x2x128xf32, #tpu.memory_space<vmem>>, vector<2x1x2x128xf32>
    %81 = vector.shape_cast %80 : vector<2x1x2x128xf32> to vector<2x2x128xf32>
    %82 = arith.subf %79, %81 : vector<2x2x128xf32>
    %83 = math.absf %82 : vector<2x2x128xf32>
    %cst_69 = arith.constant 1.000000e+00 : f32
    %84 = vector.broadcast %cst_69 : f32 to vector<2x2x128xf32>
    %85 = arith.minimumf %83, %84 : vector<2x2x128xf32>
    %cst_70 = arith.constant 5.000000e-01 : f32
    %86 = vector.broadcast %cst_70 : f32 to vector<2x2x128xf32>
    %87 = arith.mulf %86, %85 : vector<2x2x128xf32>
    %88 = arith.subf %83, %87 : vector<2x2x128xf32>
    %89 = arith.mulf %85, %88 : vector<2x2x128xf32>
    %90 = arith.addf %77, %89 : vector<2x2x128xf32>
    %c0_71 = arith.constant 0 : index
    %c5 = arith.constant 5 : index
    %c0_72 = arith.constant 0 : index
    %c0_73 = arith.constant 0 : index
    %91 = vector.load %arg5[%c0_71, %c5, %c0_72, %c0_73] : memref<2x8x2x128xf32, #tpu.memory_space<vmem>>, vector<2x1x2x128xf32>
    %92 = vector.shape_cast %91 : vector<2x1x2x128xf32> to vector<2x2x128xf32>
    %c0_74 = arith.constant 0 : index
    %c5_75 = arith.constant 5 : index
    %c0_76 = arith.constant 0 : index
    %c0_77 = arith.constant 0 : index
    %93 = vector.load %arg4[%c0_74, %c5_75, %c0_76, %c0_77] : memref<2x8x2x128xf32, #tpu.memory_space<vmem>>, vector<2x1x2x128xf32>
    %94 = vector.shape_cast %93 : vector<2x1x2x128xf32> to vector<2x2x128xf32>
    %95 = arith.subf %92, %94 : vector<2x2x128xf32>
    %96 = math.absf %95 : vector<2x2x128xf32>
    %cst_78 = arith.constant 1.000000e+00 : f32
    %97 = vector.broadcast %cst_78 : f32 to vector<2x2x128xf32>
    %98 = arith.minimumf %96, %97 : vector<2x2x128xf32>
    %cst_79 = arith.constant 5.000000e-01 : f32
    %99 = vector.broadcast %cst_79 : f32 to vector<2x2x128xf32>
    %100 = arith.mulf %99, %98 : vector<2x2x128xf32>
    %101 = arith.subf %96, %100 : vector<2x2x128xf32>
    %102 = arith.mulf %98, %101 : vector<2x2x128xf32>
    %103 = arith.addf %90, %102 : vector<2x2x128xf32>
    %c0_80 = arith.constant 0 : index
    %c6 = arith.constant 6 : index
    %c0_81 = arith.constant 0 : index
    %c0_82 = arith.constant 0 : index
    %104 = vector.load %arg5[%c0_80, %c6, %c0_81, %c0_82] : memref<2x8x2x128xf32, #tpu.memory_space<vmem>>, vector<2x1x2x128xf32>
    %105 = vector.shape_cast %104 : vector<2x1x2x128xf32> to vector<2x2x128xf32>
    %c0_83 = arith.constant 0 : index
    %c6_84 = arith.constant 6 : index
    %c0_85 = arith.constant 0 : index
    %c0_86 = arith.constant 0 : index
    %106 = vector.load %arg4[%c0_83, %c6_84, %c0_85, %c0_86] : memref<2x8x2x128xf32, #tpu.memory_space<vmem>>, vector<2x1x2x128xf32>
    %107 = vector.shape_cast %106 : vector<2x1x2x128xf32> to vector<2x2x128xf32>
    %108 = arith.subf %105, %107 : vector<2x2x128xf32>
    %109 = math.absf %108 : vector<2x2x128xf32>
    %cst_87 = arith.constant 1.000000e+00 : f32
    %110 = vector.broadcast %cst_87 : f32 to vector<2x2x128xf32>
    %111 = arith.minimumf %109, %110 : vector<2x2x128xf32>
    %cst_88 = arith.constant 5.000000e-01 : f32
    %112 = vector.broadcast %cst_88 : f32 to vector<2x2x128xf32>
    %113 = arith.mulf %112, %111 : vector<2x2x128xf32>
    %114 = arith.subf %109, %113 : vector<2x2x128xf32>
    %115 = arith.mulf %111, %114 : vector<2x2x128xf32>
    %116 = arith.addf %103, %115 : vector<2x2x128xf32>
    %c0_89 = arith.constant 0 : index
    %c7 = arith.constant 7 : index
    %c0_90 = arith.constant 0 : index
    %c0_91 = arith.constant 0 : index
    %117 = vector.load %arg5[%c0_89, %c7, %c0_90, %c0_91] : memref<2x8x2x128xf32, #tpu.memory_space<vmem>>, vector<2x1x2x128xf32>
    %118 = vector.shape_cast %117 : vector<2x1x2x128xf32> to vector<2x2x128xf32>
    %c0_92 = arith.constant 0 : index
    %c7_93 = arith.constant 7 : index
    %c0_94 = arith.constant 0 : index
    %c0_95 = arith.constant 0 : index
    %119 = vector.load %arg4[%c0_92, %c7_93, %c0_94, %c0_95] : memref<2x8x2x128xf32, #tpu.memory_space<vmem>>, vector<2x1x2x128xf32>
    %120 = vector.shape_cast %119 : vector<2x1x2x128xf32> to vector<2x2x128xf32>
    %121 = arith.subf %118, %120 : vector<2x2x128xf32>
    %122 = math.absf %121 : vector<2x2x128xf32>
    %cst_96 = arith.constant 1.000000e+00 : f32
    %123 = vector.broadcast %cst_96 : f32 to vector<2x2x128xf32>
    %124 = arith.minimumf %122, %123 : vector<2x2x128xf32>
    %cst_97 = arith.constant 5.000000e-01 : f32
    %125 = vector.broadcast %cst_97 : f32 to vector<2x2x128xf32>
    %126 = arith.mulf %125, %124 : vector<2x2x128xf32>
    %127 = arith.subf %122, %126 : vector<2x2x128xf32>
    %128 = arith.mulf %124, %127 : vector<2x2x128xf32>
    %129 = arith.addf %116, %128 : vector<2x2x128xf32>
    %c2_98 = arith.constant 2 : index
    %c0_99 = arith.constant 0 : index
    %c0_100 = arith.constant 0 : index
    %c0_101 = arith.constant 0 : index
    %130 = vector.load %arg7[%c2_98, %c0_99, %c0_100, %c0_101] : memref<3x2x2x128xf32, #tpu.memory_space<vmem>>, vector<1x2x2x128xf32>
    %131 = vector.shape_cast %130 : vector<1x2x2x128xf32> to vector<2x2x128xf32>
    %132 = arith.mulf %129, %3 : vector<2x2x128xf32>
    %133 = arith.addf %131, %132 : vector<2x2x128xf32>
    %c2_102 = arith.constant 2 : index
    %c0_103 = arith.constant 0 : index
    %c0_104 = arith.constant 0 : index
    %c0_105 = arith.constant 0 : index
    %134 = vector.load %arg7[%c2_102, %c0_103, %c0_104, %c0_105] : memref<3x2x2x128xf32, #tpu.memory_space<vmem>>, vector<1x2x2x128xf32>
    %135 = vector.shape_cast %134 : vector<1x2x2x128xf32> to vector<2x2x128xf32>
    %136 = vector.shape_cast %133 : vector<2x2x128xf32> to vector<1x2x2x128xf32>
    tpu.vector_store %arg7[%c2_102, %c0_103, %c0_104, %c0_105], %136 {strides = array<i32>} : memref<3x2x2x128xf32, #tpu.memory_space<vmem>>, vector<1x2x2x128xf32>,
    %c0_i32_106 = arith.constant 0 : i32
    %137 = arith.cmpi eq, %arg1, %c0_i32_106 : i32
    %138 = arith.extui %137 : i1 to i32
    %c0_i32_107 = arith.constant 0 : i32
    %139 = arith.cmpi ne, %138, %c0_i32_107 : i32
    scf.if %139 {
      %c0_108 = arith.constant 0 : index
      %c0_109 = arith.constant 0 : index
      %c0_110 = arith.constant 0 : index
      %c0_111 = arith.constant 0 : index
      %140 = vector.load %arg7[%c0_108, %c0_109, %c0_110, %c0_111] : memref<3x2x2x128xf32, #tpu.memory_space<vmem>>, vector<3x2x2x128xf32>
      %c0_112 = arith.constant 0 : index
      %c0_113 = arith.constant 0 : index
      %c0_114 = arith.constant 0 : index
      %c0_115 = arith.constant 0 : index
      %c0_116 = arith.constant 0 : index
      %141 = vector.load %arg6[%c0_112, %c0_113, %c0_114, %c0_115, %c0_116] : memref<1x3x2x2x128xf32, #tpu.memory_space<vmem>>, vector<1x3x2x2x128xf32>
      %142 = vector.shape_cast %141 : vector<1x3x2x2x128xf32> to vector<3x2x2x128xf32>
      %143 = vector.shape_cast %140 : vector<3x2x2x128xf32> to vector<1x3x2x2x128xf32>
      tpu.vector_store %arg6[%c0_112, %c0_113, %c0_114, %c0_115, %c0_116], %143 {strides = array<i32>} : memref<1x3x2x2x128xf32, #tpu.memory_space<vmem>>, vector<1x3x2x2x128xf32>,
    } else {
    }
    return
  }
  func.func @transform_0(%arg0: i32, %arg1: i32) -> (i32, i32, i32) {
    %c1_i32 = arith.constant 1 : i32
    %0 = arith.muli %arg0, %c1_i32 : i32
    %1 = arith.addi %0, %arg1 : i32
    %c0_i32 = arith.constant 0 : i32
    %c0_i32_0 = arith.constant 0 : i32
    %c0_i32_1 = arith.constant 0 : i32
    return %c0_i32, %1, %c0_i32_0 : i32, i32, i32
  }
  func.func @transform_1(%arg0: i32, %arg1: i32) -> (i32, i32, i32) {
    %c1_i32 = arith.constant 1 : i32
    %0 = arith.muli %arg0, %c1_i32 : i32
    %1 = arith.addi %0, %arg1 : i32
    %c0_i32 = arith.constant 0 : i32
    %c0_i32_0 = arith.constant 0 : i32
    %c0_i32_1 = arith.constant 0 : i32
    return %c0_i32, %1, %c0_i32_0 : i32, i32, i32
  }
  func.func @transform_2(%arg0: i32, %arg1: i32) -> (i32, i32, i32, i32) {
    %c1_i32 = arith.constant 1 : i32
    %0 = arith.muli %arg0, %c1_i32 : i32
    %1 = arith.addi %0, %arg1 : i32
    %c0_i32 = arith.constant 0 : i32
    %c0_i32_0 = arith.constant 0 : i32
    %c0_i32_1 = arith.constant 0 : i32
    %c0_i32_2 = arith.constant 0 : i32
    return %c0_i32, %c0_i32_0, %1, %c0_i32_1 : i32, i32, i32, i32
  }
  func.func @transform_3(%arg0: i32, %arg1: i32) -> (i32, i32, i32, i32) {
    %c1_i32 = arith.constant 1 : i32
    %0 = arith.muli %arg0, %c1_i32 : i32
    %1 = arith.addi %0, %arg1 : i32
    %c0_i32 = arith.constant 0 : i32
    %c0_i32_0 = arith.constant 0 : i32
    %c0_i32_1 = arith.constant 0 : i32
    %c0_i32_2 = arith.constant 0 : i32
    return %c0_i32, %c0_i32_0, %1, %c0_i32_1 : i32, i32, i32, i32
  }
  func.func @transform_4(%arg0: i32, %arg1: i32) -> (i32, i32, i32, i32, i32) {
    %c0_i32 = arith.constant 0 : i32
    %c0_i32_0 = arith.constant 0 : i32
    %c0_i32_1 = arith.constant 0 : i32
    %c0_i32_2 = arith.constant 0 : i32
    %c0_i32_3 = arith.constant 0 : i32
    return %arg0, %c0_i32, %c0_i32_0, %c0_i32_1, %c0_i32_2 : i32, i32, i32, i32, i32
  }
}

</mosaic_0001>

<bundles_post_ra>
// kernel: tpu_custom_call.1
= control target key start
LH: loop header
LB: loop body
LE: loop exit
PB: predicated region body
PF: predicated region fallthrough
CT: control target
= control target key end

     0   :  { %9 = vsyncpa [#allocation4], 0  ;;  %s597_s0 = inlined_call_operand.hbm [shape: f32[2,2,128], index: 0, kind: input, shape index: {}]   ;;  %s598_s1 = inlined_call_operand.hbm [shape: f32[2,2,128], index: 1, kind: input, shape index: {}]   ;;  %s599_s2 = inlined_call_operand.hbm [shape: f32[2,8,2,128], index: 2, kind: input, shape index: {}]   ;;  %s600_s3 = inlined_call_operand.hbm [shape: f32[2,8,2,128], index: 3, kind: input, shape index: {}]   ;;  %s601_s4 = inlined_call_operand.hbm [shape: f32[1,3,2,2,128], index: 4, kind: output, shape index: {}]  }
   0x1   :  { %10 = vsyncpa [#allocation7], 0 }
   0x2   :  { %11 = vsyncpa [#allocation10], 0 }
   0x3   :  { %12 = vsyncpa [#allocation5], 0  ;;  %s465_s15 = smov [#allocation6]   ;;  %s466_s17 = smov [#allocation3]  }
   0x4   :  { %s36_s16 = sshll.u32 %s465_s15, 4  ;;  %s21_s18 = sshll.u32 %s466_s17, 4  ;;  %s37_s16 = int_to_ptr.vmem [resolvable:$true] %s36_s16  ;;  %s498_s18 = int_to_ptr.vmem [resolvable:$true] %s21_s18 }
   0x5   :  { %s347_s21 = scalar_lea.hbm %s598_s1, 64 }
   0x6   :  { %p348_p0 = scmp.ne.s32.totalorder %s598_s1, %s347_s21  ;;  %p351_p1 = scmp.lt.u32.totalorder %s347_s21, %s598_s1 }
   0x8   :  { %p353_p2 = pnand %p351_p1, %p348_p0 }
   0xa   :  { %356 = shalt.err (!%p353_p2)
}
   0xb   :  { %s357_s26 = scalar_lea.vmem %s37_s16, 64  ;;  %p362_p4 = scmp.lt.s32.totalorder %s37_s16, %s37_s16 }
   0xc   :  { %p358_p3 = scmp.ne.s32.totalorder %s37_s16, %s357_s26  ;;  %p363_p5 = scmp.lt.s32.totalorder %s357_s26, %s357_s26 }
   0xe   :  { %p364_p6 = por %p363_p5, %p362_p4 }
  0x10   :  { %p365_p7 = pnand %p364_p6, %p358_p3 }
  0x12   :  { %368 = shalt.err (!%p365_p7)
}
  0x13   :  { %s467_s27 = smov 32   ;;  %s468_s28 = smov 2  }
  0x14   :  { %42 = dma.hbm_to_vmem [thread:$0]  %s598_s1, 64, %s37_s16, [#allocation7], %s467_s27, %s467_s27, %s468_s28  }
  0x15   :  { %s369_s7 = scalar_lea.hbm %s597_s0, 64 }
  0x16   :  { %p370_p8 = scmp.ne.s32.totalorder %s597_s0, %s369_s7  ;;  %p373_p9 = scmp.lt.u32.totalorder %s369_s7, %s597_s0 }
  0x18   :  { %p375_p10 = pnand %p373_p9, %p370_p8 }
  0x1a   :  { %378 = shalt.err (!%p375_p10)
}
  0x1b   :  { %s379_s12 = scalar_lea.vmem %s498_s18, 64  ;;  %p384_p12 = scmp.lt.s32.totalorder %s498_s18, %s498_s18 }
  0x1c   :  { %p380_p11 = scmp.ne.s32.totalorder %s498_s18, %s379_s12  ;;  %p385_p13 = scmp.lt.s32.totalorder %s379_s12, %s379_s12 }
  0x1e   :  { %p386_p0 = por %p385_p13, %p384_p12 }
  0x20   :  { %p387_p1 = pnand %p386_p0, %p380_p11 }
  0x22   :  { %390 = shalt.err (!%p387_p1)
}
  0x23   :  { %27 = dma.hbm_to_vmem [thread:$0]  %s597_s0, 64, %s498_s18, [#allocation4], %s467_s27, %s467_s27, %s468_s28  }
  0x24   :  { %s469_s14 = smov [#allocation8]   ;;  %s470_s16 = smov [#allocation9]  }
  0x25   :  { %s51_s15 = sshll.u32 %s469_s14, 4  ;;  %s66_s17 = sshll.u32 %s470_s16, 4  ;;  %s52_s15 = int_to_ptr.vmem [resolvable:$true] %s51_s15  ;;  %s535_s17 = int_to_ptr.vmem [resolvable:$true] %s66_s17 }
  0x26   :  { %s391_s21 = scalar_lea.hbm %s599_s2, 512 }
  0x27   :  { %p392_p2 = scmp.ne.s32.totalorder %s599_s2, %s391_s21  ;;  %p395_p3 = scmp.lt.u32.totalorder %s391_s21, %s599_s2 }
  0x29   :  { %p397_p4 = pnand %p395_p3, %p392_p2 }
  0x2b   :  { %400 = shalt.err (!%p397_p4)
}
  0x2c   :  { %s401_s0 = scalar_lea.vmem %s52_s15, 512  ;;  %p406_p6 = scmp.lt.s32.totalorder %s52_s15, %s52_s15 }
  0x2d   :  { %p402_p5 = scmp.ne.s32.totalorder %s52_s15, %s401_s0  ;;  %p407_p7 = scmp.lt.s32.totalorder %s401_s0, %s401_s0 }
  0x2f   :  { %p408_p8 = por %p407_p7, %p406_p6 }
  0x31   :  { %p409_p9 = pnand %p408_p8, %p402_p5 }
  0x33   :  { %412 = shalt.err (!%p409_p9)
}
  0x34   :  { %57 = dma.hbm_to_vmem [thread:$0]  %s599_s2, 512, %s52_s15, [#allocation7], %s467_s27, %s467_s27, %s468_s28  }
  0x35   :  { %s413_s5 = scalar_lea.hbm %s600_s3, 512 }
  0x36   :  { %p414_p10 = scmp.ne.s32.totalorder %s600_s3, %s413_s5  ;;  %p417_p11 = scmp.lt.u32.totalorder %s413_s5, %s600_s3 }
  0x38   :  { %p419_p12 = pnand %p417_p11, %p414_p10 }
  0x3a   :  { %422 = shalt.err (!%p419_p12)
}
  0x3b   :  { %s423_s10 = scalar_lea.vmem %s535_s17, 512  ;;  %p428_p0 = scmp.lt.s32.totalorder %s535_s17, %s535_s17 }
  0x3c   :  { %p424_p13 = scmp.ne.s32.totalorder %s535_s17, %s423_s10  ;;  %p429_p1 = scmp.lt.s32.totalorder %s423_s10, %s423_s10 }
  0x3e   :  { %p430_p2 = por %p429_p1, %p428_p0 }
  0x40   :  { %p431_p3 = pnand %p430_p2, %p424_p13 }
  0x42   :  { %434 = shalt.err (!%p431_p3)
}
  0x43   :  { %72 = dma.hbm_to_vmem [thread:$0]  %s600_s3, 512, %s535_s17, [#allocation10], %s467_s27, %s467_s27, %s468_s28  }
  0x44   :  { %457 = dma.done.wait [#allocation4], 64  }
  0x45   :  { %458 = vsyncadd [#allocation4], 4294967232 }
  0x46   :  { %459 = dma.done.wait [#allocation7], 576  }
  0x47   :  { %460 = vsyncadd [#allocation7], 4294966720 }
  0x48   :  { %461 = dma.done.wait [#allocation10], 512  }
  0x49   :  { %462 = vsyncadd [#allocation10], 4294966784  ;;  %v471_v0 = vmov 0.0   ;;  %v101_v1 = vld [vmem:[#allocation3] sm:$0x3]  ;;  %s472_s3 = smov [#allocation11]  }
  0x4a   :  { %93 = vst [vmem:[#allocation2] sm:$0x3] %v471_v0  ;;  %94 = vst [vmem:[#allocation2 + $0x2] sm:$0x3] %v471_v0  ;;  %v572_v2 = vld [vmem:[#allocation6] sm:$0x3] }
  0x4b   :  { %95 = vst [vmem:[#allocation2 + $0x4] sm:$0x3] %v471_v0  ;;  %96 = vst [vmem:[#allocation2 + $0x6] sm:$0x3] %v471_v0  ;;  %v103_v3 = vsub.f32 0.0, %v101_v1  ;;  %s317_s12 = sshll.u32 %s472_s3, 4  ;;  %s318_s12 = int_to_ptr.vmem [resolvable:$true] %s317_s12 }
  0x4c   :  { %97 = vst [vmem:[#allocation2 + $0x8] sm:$0x3] %v471_v0  ;;  %98 = vst [vmem:[#allocation2 + $0xa] sm:$0x3] %v471_v0  ;;  %v102_v4 = vld [vmem:[#allocation3 + $0x2] sm:$0x3]  ;;  %p440_p5 = scmp.lt.s32.totalorder %s318_s12, %s318_s12 }
  0x4d   :  { %v574_v5 = vld [vmem:[#allocation6 + $0x2] sm:$0x3]  ;;  %v104_v6 = vsub.f32 0.0, %v102_v4  ;;  %v105_v8 = vmul.f32 1.442695, %v103_v3  ;;  %s435_s1 = scalar_lea.vmem %s318_s12, 192 }
  0x4e   :  { %v130_v11 = vld [vmem:[#allocation9] sm:$0x3]  ;;  %v149_v15 = vld [vmem:[#allocation9 + $0x2] sm:$0x3]  ;;  %v169_v18 = vld [vmem:[#allocation9 + $0x4] sm:$0x3]  ;;  %p436_p4 = scmp.ne.s32.totalorder %s318_s12, %s435_s1  ;;  %p441_p6 = scmp.lt.s32.totalorder %s435_s1, %s435_s1 }
  0x4f   :  { %v107_v12 = vmul.f32 1.442695, %v104_v6  ;;  %v132_v14 = vld [vmem:[#allocation8] sm:$0x3]  ;;  %339 = vpow2.f32 %v105_v8  ;;  %v152_v17 = vld [vmem:[#allocation8 + $0x2] sm:$0x3] }
  0x50   :  { %v134_v16 = vsub.f32 %v130_v11, %v132_v14  ;;  %v172_v19 = vld [vmem:[#allocation8 + $0x4] sm:$0x3]  ;;  %v154_v20 = vsub.f32 %v149_v15, %v152_v17  ;;  %v189_v22 = vld [vmem:[#allocation9 + $0x6] sm:$0x3]  ;;  %v209_v24 = vld [vmem:[#allocation9 + $0x8] sm:$0x3]  ;;  %p442_p7 = por %p441_p6, %p440_p5 }
  0x51   :  { %341 = vpow2.f32 %v107_v12  ;;  %v174_v21 = vsub.f32 %v169_v18, %v172_v19  ;;  %v192_v23 = vld [vmem:[#allocation8 + $0x6] sm:$0x3]  ;;  %v212_v27 = vld [vmem:[#allocation8 + $0x8] sm:$0x3]  ;;  %v229_v28 = vld [vmem:[#allocation9 + $0xa] sm:$0x3] }
  0x52   :  { %v124_v7 = vld [vmem:[#allocation2 + $0x4] sm:$0x3]  ;;  %v125_v10 = vld [vmem:[#allocation2 + $0x6] sm:$0x3]  ;;  %v136_v25 = vand.u32 2147483647, %v134_v16  ;;  %v194_v26 = vsub.f32 %v189_v22, %v192_v23  ;;  %v214_v31 = vsub.f32 %v209_v24, %v212_v27  ;;  %p443_p8 = pnand %p442_p7, %p436_p4 }
  0x53   :  { %v126_v9 = vadd.f32 %v124_v7, %v572_v2  ;;  %v127_v13 = vadd.f32 %v125_v10, %v574_v5  ;;  %v156_v29 = vand.u32 2147483647, %v154_v20  ;;  %v176_v30 = vand.u32 2147483647, %v174_v21  ;;  %v232_v32 = vld [vmem:[#allocation8 + $0xa] sm:$0x3] }
  0x54   :  { %v138_v33 = vmin.f32 %v136_v25, 1.0  ;;  %v196_v34 = vand.u32 2147483647, %v194_v26  ;;  %v234_v35 = vsub.f32 %v229_v28, %v232_v32  ;;  %v249_v36 = vld [vmem:[#allocation9 + $0xc] sm:$0x3] }
  0x55   :  { %128 = vst [vmem:[#allocation2 + $0x4] sm:$0x3] %v126_v9  ;;  %129 = vst [vmem:[#allocation2 + $0x6] sm:$0x3] %v127_v13  ;;  %v158_v37 = vmin.f32 %v156_v29, 1.0  ;;  %v178_v38 = vmin.f32 %v176_v30, 1.0 }
  0x56   :  { %v216_v39 = vand.u32 2147483647, %v214_v31  ;;  %v252_v40 = vld [vmem:[#allocation8 + $0xc] sm:$0x3]  ;;  %v140_v41 = vmul.f32 0.5, %v138_v33  ;;  %v198_v42 = vmin.f32 %v196_v34, 1.0 }
  0x57   :  { %v236_v43 = vand.u32 2147483647, %v234_v35  ;;  %v254_v44 = vsub.f32 %v249_v36, %v252_v40  ;;  %v269_v45 = vld [vmem:[#allocation9 + $0xe] sm:$0x3]  ;;  %v160_v46 = vmul.f32 0.5, %v158_v37  ;;  %v180_v47 = vmul.f32 0.5, %v178_v38 }
  0x58   :  { %v218_v48 = vmin.f32 %v216_v39, 1.0  ;;  %v272_v49 = vld [vmem:[#allocation8 + $0xe] sm:$0x3]  ;;  %v142_v50 = vsub.f32 %v136_v25, %v140_v41  ;;  %v200_v51 = vmul.f32 0.5, %v198_v42  ;;  %v131_v58 = vld [vmem:[#allocation9 + $0x10] sm:$0x3] }
  0x59   :  { %v238_v52 = vmin.f32 %v236_v43, 1.0  ;;  %v256_v53 = vand.u32 2147483647, %v254_v44  ;;  %v162_v54 = vsub.f32 %v156_v29, %v160_v46  ;;  %v182_v55 = vsub.f32 %v176_v30, %v180_v47  ;;  %v133_v59 = vld [vmem:[#allocation8 + $0x10] sm:$0x3]  ;;  %v340_v60 = vpop.eup %339 }
  0x5a   :  { %v220_v56 = vmul.f32 0.5, %v218_v48  ;;  %v274_v57 = vsub.f32 %v269_v45, %v272_v49  ;;  %v144_v61 = vmul.f32 %v142_v50, %v138_v33  ;;  %v202_v62 = vsub.f32 %v196_v34, %v200_v51  ;;  %v150_v1 = vld [vmem:[#allocation9 + $0x12] sm:$0x3]  ;;  %v170_v10 = vld [vmem:[#allocation9 + $0x14] sm:$0x3] }
  0x5b   :  { %v240_v63 = vmul.f32 0.5, %v238_v52  ;;  %v258_v0 = vmin.f32 %v256_v53, 1.0  ;;  %v153_v3 = vld [vmem:[#allocation8 + $0x12] sm:$0x3]  ;;  %v342_v4 = vpop.eup %341  ;;  %v109_v6 = vadd.f32 1.0, %v340_v60  ;;  %v164_v7 = vmul.f32 %v162_v54, %v158_v37 }
  0x5c   :  { %v184_v8 = vmul.f32 %v182_v55, %v178_v38  ;;  %v222_v9 = vsub.f32 %v216_v39, %v220_v56  ;;  %v173_v11 = vld [vmem:[#allocation8 + $0x14] sm:$0x3]  ;;  %v110_v12 = vadd.f32 1.0, %v342_v4  ;;  %v204_v13 = vmul.f32 %v202_v62, %v198_v42  ;;  %v190_v16 = vld [vmem:[#allocation9 + $0x16] sm:$0x3] }
  0x5d   :  { %v242_v14 = vsub.f32 %v236_v43, %v240_v63  ;;  %v260_v15 = vmul.f32 0.5, %v258_v0  ;;  %v193_v17 = vld [vmem:[#allocation8 + $0x16] sm:$0x3]  ;;  %343 = vrcp.f32 %v109_v6  ;;  %v166_v18 = vadd.f32 %v164_v7, %v144_v61  ;;  %v210_v21 = vld [vmem:[#allocation9 + $0x18] sm:$0x3] }
  0x5e   :  { %v224_v19 = vmul.f32 %v222_v9, %v218_v48  ;;  %v276_v20 = vand.u32 2147483647, %v274_v57  ;;  %v213_v22 = vld [vmem:[#allocation8 + $0x18] sm:$0x3]  ;;  %345 = vrcp.f32 %v110_v12  ;;  %v135_v25 = vsub.f32 %v131_v58, %v133_v59  ;;  %v230_v30 = vld [vmem:[#allocation9 + $0x1a] sm:$0x3] }
  0x5f   :  { %v244_v23 = vmul.f32 %v242_v14, %v238_v52  ;;  %v262_v24 = vsub.f32 %v256_v53, %v260_v15  ;;  %v186_v26 = vadd.f32 %v184_v8, %v166_v18  ;;  %v155_v28 = vsub.f32 %v150_v1, %v153_v3  ;;  %v233_v31 = vld [vmem:[#allocation8 + $0x1a] sm:$0x3]  ;;  %v250_v48 = vld [vmem:[#allocation9 + $0x1c] sm:$0x3]  ;;  %v115_v63 = vld [vmem:[#allocation2] sm:$0x3] }
  0x60   :  { %v278_v27 = vmin.f32 %v276_v20, 1.0  ;;  %v175_v29 = vsub.f32 %v170_v10, %v173_v11  ;;  %v137_v33 = vand.u32 2147483647, %v135_v25  ;;  %v195_v34 = vsub.f32 %v190_v16, %v193_v17  ;;  %v253_v49 = vld [vmem:[#allocation8 + $0x1c] sm:$0x3] }
  0x61   :  { %v264_v32 = vmul.f32 %v262_v24, %v258_v0  ;;  %v215_v35 = vsub.f32 %v210_v21, %v213_v22  ;;  %v206_v36 = vadd.f32 %v204_v13, %v186_v26  ;;  %v157_v38 = vand.u32 2147483647, %v155_v28  ;;  %v116_v8 = vld [vmem:[#allocation2 + $0x2] sm:$0x3]  ;;  %v270_v16 = vld [vmem:[#allocation9 + $0x1e] sm:$0x3] }
  0x62   :  { %v280_v37 = vmul.f32 0.5, %v278_v27  ;;  %v177_v39 = vand.u32 2147483647, %v175_v29  ;;  %v139_v40 = vmin.f32 %v137_v33, 1.0  ;;  %v197_v41 = vand.u32 2147483647, %v195_v34 }
  0x63   :  { %v217_v42 = vand.u32 2147483647, %v215_v35  ;;  %v235_v43 = vsub.f32 %v230_v30, %v233_v31  ;;  %v226_v44 = vadd.f32 %v224_v19, %v206_v36  ;;  %v159_v46 = vmin.f32 %v157_v38, 1.0  ;;  %v273_v17 = vld [vmem:[#allocation8 + $0x1e] sm:$0x3] }
  0x64   :  { %v282_v45 = vsub.f32 %v276_v20, %v280_v37  ;;  %v179_v47 = vmin.f32 %v177_v39, 1.0  ;;  %v141_v50 = vmul.f32 0.5, %v139_v40  ;;  %v199_v51 = vmin.f32 %v197_v41, 1.0  ;;  %v289_v19 = vld [vmem:[#allocation2 + $0x8] sm:$0x3] }
  0x65   :  { %v219_v52 = vmin.f32 %v217_v42, 1.0  ;;  %v237_v53 = vand.u32 2147483647, %v235_v43  ;;  %v246_v54 = vadd.f32 %v244_v23, %v226_v44  ;;  %v161_v56 = vmul.f32 0.5, %v159_v46 }
  0x66   :  { %v284_v55 = vmul.f32 %v282_v45, %v278_v27  ;;  %v181_v57 = vmul.f32 0.5, %v179_v47  ;;  %v143_v58 = vsub.f32 %v137_v33, %v141_v50  ;;  %v201_v59 = vmul.f32 0.5, %v199_v51 }
  0x67   :  { %v221_v60 = vmul.f32 0.5, %v219_v52  ;;  %v239_v61 = vmin.f32 %v237_v53, 1.0  ;;  %v344_v62 = vpop.eup %343  ;;  %v266_v0 = vadd.f32 %v264_v32, %v246_v54  ;;  %v163_v1 = vsub.f32 %v157_v38, %v161_v56 }
  0x68   :  { %v183_v3 = vsub.f32 %v177_v39, %v181_v57  ;;  %v255_v4 = vsub.f32 %v250_v48, %v253_v49  ;;  %v346_v6 = vpop.eup %345  ;;  %v117_v7 = vmul.f32 %v344_v62, %v572_v2  ;;  %v145_v9 = vmul.f32 %v143_v58, %v139_v40 }
  0x69   :  { %v203_v10 = vsub.f32 %v197_v41, %v201_v59  ;;  %v223_v11 = vsub.f32 %v217_v42, %v221_v60  ;;  %v118_v12 = vmul.f32 %v346_v6, %v574_v5  ;;  %v286_v13 = vadd.f32 %v284_v55, %v266_v0 }
  0x6a   :  { %v165_v14 = vmul.f32 %v163_v1, %v159_v46  ;;  %v185_v15 = vmul.f32 %v183_v3, %v179_v47  ;;  %v119_v18 = vadd.f32 %v117_v7, %v115_v63  ;;  %v241_v21 = vmul.f32 0.5, %v239_v61  ;;  %v290_v46 = vld [vmem:[#allocation2 + $0xa] sm:$0x3] }
  0x6b   :  { %v205_v20 = vmul.f32 %v203_v10, %v199_v51  ;;  %v120_v22 = vadd.f32 %v118_v12, %v116_v8  ;;  %v291_v23 = vmul.f32 %v286_v13, %v572_v2  ;;  %v257_v25 = vand.u32 2147483647, %v255_v4 }
  0x6c   :  { %v167_v24 = vadd.f32 %v165_v14, %v145_v9  ;;  %121 = vst [vmem:[#allocation2] sm:$0x3] %v119_v18  ;;  %v243_v26 = vsub.f32 %v237_v53, %v241_v21  ;;  %v275_v27 = vsub.f32 %v270_v16, %v273_v17  ;;  %v225_v30 = vmul.f32 %v223_v11, %v219_v52 }
  0x6d   :  { %122 = vst [vmem:[#allocation2 + $0x2] sm:$0x3] %v120_v22  ;;  %v293_v28 = vadd.f32 %v291_v23, %v289_v19  ;;  %v259_v31 = vmin.f32 %v257_v25, 1.0 }
  0x6e   :  { %v187_v29 = vadd.f32 %v185_v15, %v167_v24  ;;  %v277_v32 = vand.u32 2147483647, %v275_v27  ;;  %v245_v34 = vmul.f32 %v243_v26, %v239_v61 }
  0x6f   :  { %295 = vst [vmem:[#allocation2 + $0x8] sm:$0x3] %v293_v28  ;;  %v261_v35 = vmul.f32 0.5, %v259_v31 }
  0x70   :  { %v207_v33 = vadd.f32 %v205_v20, %v187_v29  ;;  %v279_v36 = vmin.f32 %v277_v32, 1.0 }
  0x71   :  { %v263_v38 = vsub.f32 %v257_v25, %v261_v35 }
  0x72   :  { %v227_v37 = vadd.f32 %v225_v30, %v207_v33  ;;  %v281_v39 = vmul.f32 0.5, %v279_v36 }
  0x73   :  { %v265_v40 = vmul.f32 %v263_v38, %v259_v31 }
  0x74   :  { %v247_v2 = vadd.f32 %v245_v34, %v227_v37  ;;  %v283_v41 = vsub.f32 %v277_v32, %v281_v39  ;;  %v300_v42 = vld [vmem:[#allocation2] sm:$0xff]  }
  0x75   :  { %306 = vst [vmem:[#allocation11] sm:$0xff] %v300_v42  }
  0x76   :  { %v267_v43 = vadd.f32 %v265_v40, %v247_v2  ;;  %v285_v44 = vmul.f32 %v283_v41, %v279_v36 }
  0x78   :  { %v287_v45 = vadd.f32 %v285_v44, %v267_v43 }
  0x7a   :  { %v292_v47 = vmul.f32 %v287_v45, %v574_v5 }
  0x7c   :  { %v294_v48 = vadd.f32 %v292_v47, %v290_v46 }
  0x7e   :  { %296 = vst [vmem:[#allocation2 + $0xa] sm:$0x3] %v294_v48 }
  0x85   :  { %v304_v49 = vld [vmem:[#allocation2 + $0x8] sm:$0xf]  }
  0x86   :  { %310 = vst [vmem:[#allocation11 + $0x8] sm:$0xf] %v304_v49  }
  0x87   :  { %446 = shalt.err (!%p443_p8)
}
  0x88   :  { %s447_s15 = scalar_lea.hbm %s601_s4, 192 }
  0x89   :  { %p448_p9 = scmp.ne.s32.totalorder %s601_s4, %s447_s15  ;;  %p451_p10 = scmp.lt.u32.totalorder %s447_s15, %s601_s4 }
  0x8b   :  { %p453_p11 = pnand %p451_p10, %p448_p9 }
  0x8d   :  { %456 = shalt.err (!%p453_p11)
}
  0x8e   :  { %323 = dma.vmem_to_hbm [thread:$0]  %s318_s12, 192, %s601_s4, [#allocation5], %s467_s27, %s467_s27, %s468_s28  }
  0x8f   :  { %463 = dma.done.wait [#allocation5], 192  }
  0x90   :  { %464 = vsyncadd [#allocation5], 4294967104 }
  0x91   :  { %327 = vsyncpa [#allocation4], 1 }
  0x92   :  { %328 = vsyncpa [#allocation7], 1 }
  0x93   :  { %329 = vsyncpa [#allocation10], 1 }
  0x94   :  { %330 = vsyncpa [#allocation5], 1 }

</bundles_post_ra>
